<compile_context>
chip_gen: v7x
topology: tpu7x:2x2x1
jax: 0.10.0
libtpu: 0.0.40
codegen_flags: <defaults>
</compile_context>

<pallas_src>
import functools
import math

import jax
import jax.numpy as jnp
from jax import lax
from jax.experimental import pallas as pl
from jax.experimental.pallas import tpu as pltpu


def _round_up(x, m):
    return (x + m - 1) // m * m


# ----------------------------------------------------------------------------
# Tiled linear kernel:  y = x @ w_t + b   (w_t is the pre-transposed (K, N) bf16
# weight; PyTorch nn.Linear semantics y = x @ W^T + b are preserved by the host
# transposing W once).
# ----------------------------------------------------------------------------
def _linear_kernel(x_ref, wt_ref, b_ref, o_ref, acc_ref):
    @pl.when(pl.program_id(2) == 0)
    def _():
        acc_ref[...] = jnp.zeros_like(acc_ref)

    # bf16 operands, f32 accumulation: canonical (tm,tk)@(tk,tn) MXU feed.
    acc_ref[...] += jnp.dot(x_ref[...].astype(jnp.bfloat16), wt_ref[...],
                            preferred_element_type=jnp.float32)

    @pl.when(pl.program_id(2) == pl.num_programs(2) - 1)
    def _():
        o_ref[...] = (acc_ref[...] + b_ref[...]).astype(o_ref.dtype)


def linear(x, w_t, b, *, out_dtype=jnp.float32,
           tm_pref=256, tn_pref=256, tk_pref=512):
    """x: (M, K), w_t: (K, N) bf16 (pre-transposed), b: (N,) f32 -> (M, N)."""
    M, K = x.shape
    N = w_t.shape[1]

    tm = min(tm_pref, _round_up(M, 8))
    tn = min(tn_pref, _round_up(N, 128))
    tk = min(tk_pref, _round_up(K, 128))
    Mp, Np, Kp = _round_up(M, tm), _round_up(N, tn), _round_up(K, tk)

    # Pad to tile multiples: zero K-padding keeps the matmul exact, padded M/N
    # rows/cols are sliced off. This replaces the old full-dim fallback that
    # could emit illegal or VMEM-busting blocks for awkward production shapes.
    if (Mp, Kp) != (M, K):
        x = jnp.pad(x, ((0, Mp - M), (0, Kp - K)))
    if (Kp, Np) != (K, N):
        w_t = jnp.pad(w_t, ((0, Kp - K), (0, Np - N)))
    if Np != N:
        b = jnp.pad(b, (0, Np - N))

    out = pl.pallas_call(
        _linear_kernel,
        grid=(Mp // tm, Np // tn, Kp // tk),
        in_specs=[
            pl.BlockSpec((tm, tk), lambda i, j, k: (i, k)),
            pl.BlockSpec((tk, tn), lambda i, j, k: (k, j)),
            pl.BlockSpec((1, tn), lambda i, j, k: (0, j)),
        ],
        out_specs=pl.BlockSpec((tm, tn), lambda i, j, k: (i, j)),
        out_shape=jax.ShapeDtypeStruct((Mp, Np), out_dtype),
        scratch_shapes=[pltpu.VMEM((tm, tn), jnp.float32)],
        compiler_params=pltpu.CompilerParams(
            dimension_semantics=("parallel", "parallel", "arbitrary"),
            # NOTE: raise toward 64-96 MiB on v5e/v6e (128 MiB physical VMEM);
            # kept at the 32 MiB scoped default so the same code fits v7x.
            vmem_limit_bytes=32 * 1024 * 1024),
    )(x, w_t, b.reshape(1, Np))
    if (Mp, Np) != (M, N):
        out = out[:M, :N]
    return out


# ----------------------------------------------------------------------------
# Attention kernel: grid = (batch, Lq-tile).  Heads handled inside via static
# ref slices; per-head context accumulated into a (tq, H) VMEM scratch and
# written back once, lane-dense.  1/scale is already folded into Q (gen/mul)
# or into vw/vb (add) by the host wrapper, so no in-kernel scaling.
# ----------------------------------------------------------------------------
def _attn_kernel(mech, n_heads, d,
                 q_ref, k_ref, v_ref, ww_ref, bw_ref, wu_ref, bu_ref,
                 vw_ref, vb_ref, x_ref, a_ref, ctx_acc):
    bf16 = jnp.bfloat16
    Lk = k_ref.shape[0]

    for h in range(n_heads):
        sl = slice(h * d, (h + 1) * d)
        q = q_ref[:, sl].astype(bf16)          # (tq, d) -- ref slice, no full-tile load
        k = k_ref[:, sl].astype(bf16)          # (Lk, d)

        if mech == "gen":
            energy = lax.dot_general(
                q, k, (((1,), (1,)), ((), ())),
                preferred_element_type=jnp.float32)          # (tq, Lk), scale in q
        elif mech == "mul":
            wk = jnp.dot(k, ww_ref[...],
                         preferred_element_type=jnp.float32) + bw_ref[...]   # (Lk, d)
            energy = lax.dot_general(
                q, wk.astype(bf16), (((1,), (1,)), ((), ())),
                preferred_element_type=jnp.float32)
        elif mech == "add":
            wq = jnp.dot(q, ww_ref[...],
                         preferred_element_type=jnp.float32) + bw_ref[...]   # (tq, d)
            uk = jnp.dot(k, wu_ref[...],
                         preferred_element_type=jnp.float32) + bu_ref[...]   # (Lk, d)
            vw = vw_ref[...]                   # (1, d) f32, already carries 1/scale
            ck = min(Lk, 256)                  # bound the (tq, ck, d) tanh temp (VMEM)
            chunks = []
            for s in range(0, Lk, ck):
                c = min(ck, Lk - s)
                t = jnp.tanh(wq[:, None, :] + uk[s:s + c][None, :, :])   # (tq, c, d)
                # TODO(synk): on v6e/v7x compute tanh in bf16 and feed the d-reduction
                # to the MXU via a head-major layout; kept f32 here for v5e safety.
                chunks.append(jnp.sum(t * vw[None, :, :], axis=-1))
            energy = chunks[0] if len(chunks) == 1 else jnp.concatenate(chunks, axis=-1)
            energy = energy + vb_ref[...]      # vb already carries 1/scale
        else:
            raise ValueError(f"unknown mech {mech}")

        # TODO(synk): optional `mask` argument (masked_fill with -1e10) not wired in;
        # this implementation covers the mask=None path only.

        m = jnp.max(energy, axis=-1, keepdims=True)
        e = jnp.exp(energy - m)
        # Exact reciprocal so the loosened test tolerances stay comfortable;
        # use pl.reciprocal(..., approx=True) in production (EUP slot, ~free).
        attn = e * pl.reciprocal(jnp.sum(e, axis=-1, keepdims=True))

        a_ref[h, :, :] = attn                  # (tq, Lk) lane-dense per-head slab
        # dropout(attention) is identity here (eval / p=0).
        ctx_acc[:, sl] = lax.dot_general(
            attn.astype(bf16), v_ref[:, sl].astype(bf16),
            (((1,), (0,)), ((), ())), preferred_element_type=jnp.float32)

    # Single lane-dense full-width store of the context block (no per-head
    # masked partial stores to HBM-backed output).
    x_ref[...] = ctx_acc[...].astype(x_ref.dtype)


def _q_tile(Lq, pref=256):
    if Lq <= pref:
        return Lq
    t = (pref // 8) * 8
    while t >= 8:
        if Lq % t == 0:
            return t
        t -= 8
    return Lq


def attention(q, k, v, ww_t, bw, wu_t, bu, vw, vb, mech, n_heads, d):
    """q: (B, Lq, H) bf16, k/v: (B, Lk, H) bf16 (natural projection layout)."""
    B, Lq, H = q.shape
    Lk = k.shape[1]
    tq = _q_tile(Lq)

    kern = functools.partial(_attn_kernel, mech, n_heads, d)

    ctx, attn = pl.pallas_call(
        kern,
        grid=(B, Lq // tq),                   # 2 parallel axes -> v7x megacore sharding
        in_specs=[
            pl.BlockSpec((None, tq, H), lambda b, qi: (b, qi, 0)),   # Q tile
            pl.BlockSpec((None, Lk, H), lambda b, qi: (b, 0, 0)),    # K (full Lk)
            pl.BlockSpec((None, Lk, H), lambda b, qi: (b, 0, 0)),    # V (full Lk)
            pl.BlockSpec((d, d), lambda b, qi: (0, 0)),              # W^T (bf16)
            pl.BlockSpec((1, d), lambda b, qi: (0, 0)),              # bW
            pl.BlockSpec((d, d), lambda b, qi: (0, 0)),              # U^T (bf16)
            pl.BlockSpec((1, d), lambda b, qi: (0, 0)),              # bU
            pl.BlockSpec((1, d), lambda b, qi: (0, 0)),              # v (scaled for 'add')
            pl.BlockSpec((1, 1), lambda b, qi: (0, 0)),              # v bias
        ],
        out_specs=[
            pl.BlockSpec((None, tq, H), lambda b, qi: (b, qi, 0)),               # context
            pl.BlockSpec((None, n_heads, tq, Lk), lambda b, qi: (b, 0, qi, 0)),  # probs
        ],
        out_shape=[
            jax.ShapeDtypeStruct((B, Lq, H), jnp.bfloat16),
            jax.ShapeDtypeStruct((B, n_heads, Lq, Lk), jnp.float32),
        ],
        scratch_shapes=[pltpu.VMEM((tq, H), jnp.float32)],
        compiler_params=pltpu.CompilerParams(
            dimension_semantics=("parallel", "parallel"),
            vmem_limit_bytes=32 * 1024 * 1024),
    )(q, k, v, ww_t, bw.reshape(1, d), wu_t, bu.reshape(1, d),
      vw, vb.reshape(1, 1))
    # TODO(synk): for very long Lk, stream Lk with online softmax (the full
    # (B,nH,Lq,Lk) probability output is part of the module contract here).
    return ctx, attn


# ----------------------------------------------------------------------------
# Full forward pass: projections -> attention -> output projection.
# No host-side transposes of activations; weight transposes/casts are the
# one-time parameter-load cost recommended by the review.
# ----------------------------------------------------------------------------
def mha_forward(params, query, key, value, mech):
    B, Lq, H = query.shape
    Lk = key.shape[1]
    nH = params["n_heads"]
    d = H // nH
    inv_scale = 1.0 / math.sqrt(d)
    bf = jnp.bfloat16

    # Fold 1/scale into the Q projection (gen/mul) or into the scoring vector v
    # (add) so the kernel never scales an (Lq, Lk) energy tile.
    if mech in ("gen", "mul"):
        wq_t = (params["wq"].T * inv_scale).astype(bf)
        bq = params["bq"] * inv_scale
        vw, vb = params["vw"], params["vb"]
    else:  # 'add'
        wq_t = params["wq"].T.astype(bf)
        bq = params["bq"]
        vw, vb = params["vw"] * inv_scale, params["vb"] * inv_scale

    wk_t = params["wk"].T.astype(bf)
    wv_t = params["wv"].T.astype(bf)
    wo_t = params["wo"].T.astype(bf)
    ww_t = params["ww"].T.astype(bf)
    wu_t = params["wu"].T.astype(bf)

    # Q/K/V projections emit bf16 (halves HBM traffic feeding attention).
    Q = linear(query.reshape(B * Lq, H), wq_t, bq,
               out_dtype=bf).reshape(B, Lq, H)
    K = linear(key.reshape(B * Lk, H), wk_t, params["bk"],
               out_dtype=bf).reshape(B, Lk, H)
    V = linear(value.reshape(B * Lk, H), wv_t, params["bv"],
               out_dtype=bf).reshape(B, Lk, H)

    ctx, attn = attention(Q, K, V, ww_t, params["bw"], wu_t, params["bu"],
                          vw, vb, mech, nH, d)

    out = linear(ctx.reshape(B * Lq, H), wo_t, params["bo"],
                 out_dtype=jnp.float32).reshape(B, Lq, H)
    return out, attn


# ----------------------------------------------------------------------------
# Pure-JAX f32 reference (mirrors the PyTorch code) for correctness checking.
# ----------------------------------------------------------------------------
def mha_reference(params, query, key, value, mech):
    B, Lq, H = query.shape
    Lk = key.shape[1]
    nH = params["n_heads"]
    d = H // nH
    scale = math.sqrt(d)

    lin = lambda x, w, b: x @ w.T + b
    Q = lin(query, params["wq"], params["bq"])
    K = lin(key, params["wk"], params["bk"])
    V = lin(value, params["wv"], params["bv"])

    Qh = Q.reshape(B, Lq, nH, d).transpose(0, 2, 1, 3)
    Kh = K.reshape(B, Lk, nH, d).transpose(0, 2, 1, 3)
    Vh = V.reshape(B, Lk, nH, d).transpose(0, 2, 1, 3)

    if mech == "gen":
        energy = jnp.einsum("bhqd,bhkd->bhqk", Qh, Kh) / scale
    elif mech == "mul":
        WK = Kh @ params["ww"].T + params["bw"]
        energy = jnp.einsum("bhqd,bhkd->bhqk", Qh, WK) / scale
    elif mech == "add":
        wq = Qh @ params["ww"].T + params["bw"]
        uk = Kh @ params["wu"].T + params["bu"]
        t = jnp.tanh(wq[:, :, :, None, :] + uk[:, :, None, :, :])
        energy = (jnp.einsum("bhqkd,d->bhqk", t, params["vw"][0])
                  + params["vb"][0]) / scale
    attn = jax.nn.softmax(energy, axis=-1)
    x = jnp.einsum("bhqk,bhkd->bhqd", attn, Vh)
    x = x.transpose(0, 2, 1, 3).reshape(B, Lq, H)
    out = x @ params["wo"].T + params["bo"]
    return out, attn


# ----------------------------------------------------------------------------
# Deterministic parameter init (PyTorch nn.Linear default U(-1/sqrt(in), 1/sqrt(in)))
# ----------------------------------------------------------------------------
def init_params(key, hid_dim, n_heads):
    d = hid_dim // n_heads
    ks = jax.random.split(key, 14)

    def lin(kw, kb, out_f, in_f):
        bound = 1.0 / math.sqrt(in_f)
        w = jax.random.uniform(kw, (out_f, in_f), jnp.float32, -bound, bound)
        b = jax.random.uniform(kb, (out_f,), jnp.float32, -bound, bound)
        return w, b

    wq, bq = lin(ks[0], ks[1], hid_dim, hid_dim)
    wk, bk = lin(ks[2], ks[3], hid_dim, hid_dim)
    wv, bv = lin(ks[4], ks[5], hid_dim, hid_dim)
    wo, bo = lin(ks[6], ks[7], hid_dim, hid_dim)
    ww, bw = lin(ks[8], ks[9], d, d)
    wu, bu = lin(ks[10], ks[11], d, d)
    vw, vb = lin(ks[12], ks[13], 1, d)
    return dict(n_heads=n_heads, wq=wq, bq=bq, wk=wk, bk=bk, wv=wv, bv=bv,
                wo=wo, bo=bo, ww=ww, bw=bw, wu=wu, bu=bu, vw=vw, vb=vb)


if __name__ == "__main__":
    B, L, hid_dim, n_heads = 2, 8, 32, 4

    key = jax.random.PRNGKey(0)
    kp, kq, kk, kv = jax.random.split(key, 4)
    params = init_params(kp, hid_dim, n_heads)

    query = jax.random.normal(kq, (B, L, hid_dim), jnp.float32)
    key_in = jax.random.normal(kk, (B, L, hid_dim), jnp.float32)
    value = jax.random.normal(kv, (B, L, hid_dim), jnp.float32)

    for mech in ("gen", "mul", "add"):
        out, attn = mha_forward(params, query, key_in, value, mech)
        out = jax.block_until_ready(out)
        attn = jax.block_until_ready(attn)

        out_ref, attn_ref = mha_reference(params, query, key_in, value, mech)
        assert out.shape == (B, L, hid_dim)
        assert attn.shape == (B, n_heads, L, L)
        # Tolerances loosened for the bf16-operand / f32-accumulation MXU path.
        assert jnp.allclose(out, out_ref, atol=5e-2, rtol=5e-2), f"out mismatch ({mech})"
        assert jnp.allclose(attn, attn_ref, atol=3e-2, rtol=3e-2), f"attn mismatch ({mech})"

    print("KERNEL_OK")
</pallas_src>

<mosaic_0001>
module attributes {stable_mosaic.version = 11 : i64} {
  func.func @_linear_kernel(%arg0: i32, %arg1: i32, %arg2: i32, %arg3: memref<16x128xf32, #tpu.memory_space<vmem>>, %arg4: memref<128x128xbf16, #tpu.memory_space<vmem>>, %arg5: memref<1x128xf32, #tpu.memory_space<vmem>>, %arg6: memref<16x128xbf16, #tpu.memory_space<vmem>>, %arg7: memref<16x128xf32, #tpu.memory_space<vmem>>) attributes {dimension_semantics = [#tpu.dimension_semantics<parallel>, #tpu.dimension_semantics<parallel>, #tpu.dimension_semantics<arbitrary>], iteration_bounds = array<i64: 1, 1, 1>, scalar_prefetch = 0 : i64, scratch_operands = 1 : i64, tpu.core_type = #tpu.core_type<tc>, window_params = [{transform_indices = @transform_0, window_bounds = array<i64: 16, 128>}, {transform_indices = @transform_1, window_bounds = array<i64: 128, 128>}, {transform_indices = @transform_2, window_bounds = array<i64: 1, 128>}, {transform_indices = @transform_3, window_bounds = array<i64: 16, 128>}]} {
    %c0_i32 = arith.constant 0 : i32
    %0 = arith.cmpi eq, %arg2, %c0_i32 : i32
    %1 = arith.extui %0 : i1 to i32
    %c0_i32_0 = arith.constant 0 : i32
    %2 = arith.cmpi ne, %1, %c0_i32_0 : i32
    scf.if %2 {
      %cst_10 = arith.constant 0.000000e+00 : f32
      %13 = vector.broadcast %cst_10 : f32 to vector<16x128xf32>
      %c0_11 = arith.constant 0 : index
      %c0_12 = arith.constant 0 : index
      %14 = vector.load %arg7[%c0_11, %c0_12] : memref<16x128xf32, #tpu.memory_space<vmem>>, vector<16x128xf32>
      tpu.vector_store %arg7[%c0_11, %c0_12], %13 {strides = array<i32>} : memref<16x128xf32, #tpu.memory_space<vmem>>, vector<16x128xf32>,
    } else {
    }
    %c0 = arith.constant 0 : index
    %c0_1 = arith.constant 0 : index
    %3 = vector.load %arg7[%c0, %c0_1] : memref<16x128xf32, #tpu.memory_space<vmem>>, vector<16x128xf32>
    %c0_2 = arith.constant 0 : index
    %c0_3 = arith.constant 0 : index
    %4 = vector.load %arg3[%c0_2, %c0_3] : memref<16x128xf32, #tpu.memory_space<vmem>>, vector<16x128xf32>
    %5 = arith.truncf %4 : vector<16x128xf32> to vector<16x128xbf16>
    %c0_4 = arith.constant 0 : index
    %c0_5 = arith.constant 0 : index
    %6 = vector.load %arg4[%c0_4, %c0_5] : memref<128x128xbf16, #tpu.memory_space<vmem>>, vector<128x128xbf16>
    %cst = arith.constant dense<0.000000e+00> : vector<16x128xf32>
    %7 = tpu.matmul %5, %6, %cst {dimension_numbers = #tpu.dot_dimension_numbers<[1], [0], [0], [1], [0, 0, 1, 1], [], []>} : vector<16x128xbf16>, vector<128x128xbf16>, vector<16x128xf32> -> vector<16x128xf32>
    %8 = arith.addf %3, %7 : vector<16x128xf32>
    %c0_6 = arith.constant 0 : index
    %c0_7 = arith.constant 0 : index
    %9 = vector.load %arg7[%c0_6, %c0_7] : memref<16x128xf32, #tpu.memory_space<vmem>>, vector<16x128xf32>
    tpu.vector_store %arg7[%c0_6, %c0_7], %8 {strides = array<i32>} : memref<16x128xf32, #tpu.memory_space<vmem>>, vector<16x128xf32>,
    %c0_i32_8 = arith.constant 0 : i32
    %10 = arith.cmpi eq, %arg2, %c0_i32_8 : i32
    %11 = arith.extui %10 : i1 to i32
    %c0_i32_9 = arith.constant 0 : i32
    %12 = arith.cmpi ne, %11, %c0_i32_9 : i32
    scf.if %12 {
      %c0_10 = arith.constant 0 : index
      %c0_11 = arith.constant 0 : index
      %13 = vector.load %arg7[%c0_10, %c0_11] : memref<16x128xf32, #tpu.memory_space<vmem>>, vector<16x128xf32>
      %c0_12 = arith.constant 0 : index
      %c0_13 = arith.constant 0 : index
      %14 = vector.load %arg5[%c0_12, %c0_13] : memref<1x128xf32, #tpu.memory_space<vmem>>, vector<1x128xf32>
      %15 = vector.broadcast %14 : vector<1x128xf32> to vector<16x128xf32>
      %16 = arith.addf %13, %15 : vector<16x128xf32>
      %17 = arith.truncf %16 : vector<16x128xf32> to vector<16x128xbf16>
      %c0_14 = arith.constant 0 : index
      %c0_15 = arith.constant 0 : index
      %18 = vector.load %arg6[%c0_14, %c0_15] : memref<16x128xbf16, #tpu.memory_space<vmem>>, vector<16x128xbf16>
      tpu.vector_store %arg6[%c0_14, %c0_15], %17 {strides = array<i32>} : memref<16x128xbf16, #tpu.memory_space<vmem>>, vector<16x128xbf16>,
    } else {
    }
    return
  }
  func.func @transform_0(%arg0: i32, %arg1: i32, %arg2: i32) -> (i32, i32) {
    %c0_i32 = arith.constant 0 : i32
    return %arg0, %arg2 : i32, i32
  }
  func.func @transform_1(%arg0: i32, %arg1: i32, %arg2: i32) -> (i32, i32) {
    %c0_i32 = arith.constant 0 : i32
    return %arg2, %arg1 : i32, i32
  }
  func.func @transform_2(%arg0: i32, %arg1: i32, %arg2: i32) -> (i32, i32) {
    %c0_i32 = arith.constant 0 : i32
    %c0_i32_0 = arith.constant 0 : i32
    return %c0_i32, %arg1 : i32, i32
  }
  func.func @transform_3(%arg0: i32, %arg1: i32, %arg2: i32) -> (i32, i32) {
    %c0_i32 = arith.constant 0 : i32
    return %arg0, %arg1 : i32, i32
  }
}

</mosaic_0001>

<bundles_post_ra>
// kernel: tpu_custom_call.1
= control target key start
LH: loop header
LB: loop body
LE: loop exit
PB: predicated region body
PF: predicated region fallthrough
CT: control target
= control target key end

     0   :  { %8 = vsyncpa [#allocation4], 0  ;;  %s416_s0 = inlined_call_operand.hbm [shape: f32[16,128], index: 0, kind: input, shape index: {}]   ;;  %s417_s1 = inlined_call_operand.hbm [shape: bf16[128,128], index: 1, kind: input, shape index: {}]   ;;  %s418_s2 = inlined_call_operand.vmem [shape: f32[1,128], index: 2, kind: input, shape index: {}]   ;;  %s419_s3 = inlined_call_operand.hbm [shape: bf16[16,128], index: 3, kind: output, shape index: {}]  }
   0x1   :  { %9 = vsyncpa [#allocation7], 0 }
   0x2   :  { %10 = vsyncpa [#allocation5], 0  ;;  %s342_s12 = smov [#allocation3]   ;;  %s270_s16 = scalar_lea.hbm %s416_s0, 256 }
   0x3   :  { %s16_s13 = sshll.u32 %s342_s12, 4  ;;  %p271_p0 = scmp.ne.s32.totalorder %s416_s0, %s270_s16  ;;  %s17_s13 = int_to_ptr.vmem [resolvable:$true] %s16_s13 }
   0x4   :  { %p274_p1 = scmp.lt.u32.totalorder %s270_s16, %s416_s0 }
   0x6   :  { %p276_p2 = pnand %p274_p1, %p271_p0 }
   0x8   :  { %279 = shalt.err (!%p276_p2)
}
   0x9   :  { %s280_s21 = scalar_lea.vmem %s17_s13, 256  ;;  %p285_p4 = scmp.lt.s32.totalorder %s17_s13, %s17_s13 }
   0xa   :  { %p281_p3 = scmp.ne.s32.totalorder %s17_s13, %s280_s21  ;;  %p286_p5 = scmp.lt.s32.totalorder %s280_s21, %s280_s21 }
   0xc   :  { %p287_p6 = por %p286_p5, %p285_p4 }
   0xe   :  { %p288_p7 = pnand %p287_p6, %p281_p3 }
  0x10   :  { %291 = shalt.err (!%p288_p7)
}
  0x11   :  { %s343_s22 = smov 128   ;;  %s344_s23 = smov 8  }
  0x12   :  { %22 = dma.hbm_to_vmem [thread:$0]  %s416_s0, 256, %s17_s13, [#allocation4], %s343_s22, %s343_s22, %s344_s23  }
  0x13   :  { %s345_s26 = smov [#allocation6]   ;;  %s292_s30 = scalar_lea.hbm %s417_s1, 1024 }
  0x14   :  { %s28_s27 = sshll.u32 %s345_s26, 4  ;;  %p293_p8 = scmp.ne.s32.totalorder %s417_s1, %s292_s30  ;;  %s29_s27 = int_to_ptr.vmem [resolvable:$true] %s28_s27 }
  0x15   :  { %p296_p9 = scmp.lt.u32.totalorder %s292_s30, %s417_s1 }
  0x17   :  { %p298_p10 = pnand %p296_p9, %p293_p8 }
  0x19   :  { %301 = shalt.err (!%p298_p10)
}
  0x1a   :  { %s302_s8 = scalar_lea.vmem %s29_s27, 1024  ;;  %p307_p12 = scmp.lt.s32.totalorder %s29_s27, %s29_s27 }
  0x1b   :  { %p303_p11 = scmp.ne.s32.totalorder %s29_s27, %s302_s8  ;;  %p308_p13 = scmp.lt.s32.totalorder %s302_s8, %s302_s8 }
  0x1d   :  { %p309_p0 = por %p308_p13, %p307_p12 }
  0x1f   :  { %p310_p1 = pnand %p309_p0, %p303_p11 }
  0x21   :  { %313 = shalt.err (!%p310_p1)
}
  0x22   :  { %s346_s0 = smov 64   ;;  %s347_s9 = smov 4  }
  0x23   :  { %34 = dma.hbm_to_vmem [thread:$0]  %s417_s1, 1024, %s29_s27, [#allocation7], %s346_s0, %s346_s0, %s347_s9  }
  0x24   :  { %336 = dma.done.wait [#allocation4], 256  }
  0x25   :  { %337 = vsyncadd [#allocation4], 4294967040 }
  0x26   :  { %338 = dma.done.wait [#allocation7], 1024  }
  0x27   :  { %339 = vsyncadd [#allocation7], 4294966272  ;;  %v348_v0 = vmov 0.0   ;;  %vm349_vm0 = vmmov 0   ;;  %v262_v1 = vld [vmem:[#allocation6] sm:$0xff]   ;;  %v263_v2 = vld [vmem:[#allocation6 + $0x8] sm:$0xff]  }
  0x28   :  { %233 = vmatprep.subr.bf16.mxu0 %v348_v0  ;;  %249 = vmatprep.mubr.msk.bf16.mxu0 %vm349_vm0, %v348_v0  ;;  %v264_v3 = vld [vmem:[#allocation6 + $0x10] sm:$0xff]   ;;  %v265_v4 = vld [vmem:[#allocation6 + $0x18] sm:$0xff]   ;;  %v266_v5 = vld [vmem:[#allocation6 + $0x20] sm:$0xff]   ;;  %s350_s13 = smov [#allocation8]  }
  0x29   :  { %234 = vmatpush3.bf16.msra.mxu0 %v262_v1  ;;  %v267_v6 = vld [vmem:[#allocation6 + $0x28] sm:$0xff]   ;;  %v268_v7 = vld [vmem:[#allocation6 + $0x30] sm:$0xff]   ;;  %v269_v8 = vld [vmem:[#allocation6 + $0x38] sm:$0xff]   ;;  %s193_s14 = sshll.u32 %s350_s13, 4  ;;  %s194_s14 = int_to_ptr.vmem [resolvable:$true] %s193_s14 }
  0x2a   :  { %235 = vmatprep.subr.bf16.mxu0 %v348_v0  ;;  %v52_v9 = vld [vmem:[#allocation3] sm:$0xff]  ;;  %v53_v10 = vld [vmem:[#allocation3 + $0x8] sm:$0xff]  ;;  %s314_s15 = scalar_lea.vmem %s194_s14, 128  ;;  %p319_p3 = scmp.lt.s32.totalorder %s194_s14, %s194_s14 }
  0x2b   :  { %v54_v11 = vpack.c.bf16 %v53_v10, %v52_v9  ;;  %v214_v13 = vld [vmem:[%s418_s2] ss:$0 sm:$0xff]  ;;  %p315_p2 = scmp.ne.s32.totalorder %s194_s14, %s314_s15  ;;  %p320_p4 = scmp.lt.s32.totalorder %s314_s15, %s314_s15 }
  0x2d   :  { %236 = vmatpush3.bf16.msra.mxu0 %v263_v2  ;;  %p321_p5 = por %p320_p4, %p319_p3 }
  0x2e   :  { %237 = vmatprep.subr.bf16.mxu0 %v348_v0 }
  0x2f   :  { %p322_p6 = pnand %p321_p5, %p315_p2 }
  0x31   :  { %238 = vmatpush3.bf16.msra.mxu0 %v264_v3 }
  0x32   :  { %239 = vmatprep.subr.bf16.mxu0 %v348_v0 }
  0x35   :  { %240 = vmatpush3.bf16.msra.mxu0 %v265_v4 }
  0x36   :  { %241 = vmatprep.subr.bf16.mxu0 %v348_v0 }
  0x39   :  { %242 = vmatpush3.bf16.msra.mxu0 %v266_v5 }
  0x3a   :  { %243 = vmatprep.subr.bf16.mxu0 %v348_v0 }
  0x3d   :  { %244 = vmatpush3.bf16.msra.mxu0 %v267_v6 }
  0x3e   :  { %245 = vmatprep.subr.bf16.mxu0 %v348_v0 }
  0x41   :  { %246 = vmatpush3.bf16.msra.mxu0 %v268_v7 }
  0x42   :  { %247 = vmatprep.subr.bf16.mxu0 %v348_v0 }
  0x45   :  { %248 = vmatpush3.bf16.msra.mxu0 %v269_v8 }
  0x48   :  { %250 = vmatmul.mubr.bf16.vlgmr.msra.gmra.mrb[0].mxu0 %v54_v11 }
 0x11b   :  { %v153_v12 = vpop.f32.mrb[0].mxu0 }
 0x11c   :  { %v251_v14 = vpop.f32.mrb[1].mxu0  ;;  %v176_v16 = vadd.f32 %v214_v13, %v153_v12 }
 0x11d   :  { %v156_v15 = vpop.f32.mrb[2].mxu0 }
 0x11e   :  { %v177_v17 = vadd.f32 %v214_v13, %v156_v15  ;;  %v252_v18 = vpop.f32.mrb[3].mxu0 }
 0x120   :  { %v222_v19 = vpack.c.bf16 %v177_v17, %v176_v16 }
 0x122   :  { %223 = vst [vmem:[#allocation8] sm:$0xff] %v222_v19  }
 0x123   :  { %325 = shalt.err (!%p322_p6)
}
 0x124   :  { %s326_s2 = scalar_lea.hbm %s419_s3, 128 }
 0x125   :  { %p327_p7 = scmp.ne.s32.totalorder %s419_s3, %s326_s2  ;;  %p330_p8 = scmp.lt.u32.totalorder %s326_s2, %s419_s3 }
 0x127   :  { %p332_p9 = pnand %p330_p8, %p327_p7 }
 0x129   :  { %335 = shalt.err (!%p332_p9)
}
 0x12a   :  { %199 = dma.vmem_to_hbm [thread:$0]  %s194_s14, 128, %s419_s3, [#allocation5], %s346_s0, %s346_s0, %s347_s9  }
 0x12b   :  { %340 = dma.done.wait [#allocation5], 128  }
 0x12c   :  { %341 = vsyncadd [#allocation5], 4294967168 }
 0x12d   :  { %203 = vsyncpa [#allocation4], 1 }
 0x12e   :  { %204 = vsyncpa [#allocation7], 1 }
 0x12f   :  { %205 = vsyncpa [#allocation5], 1 }

</bundles_post_ra>
